<compile_context>
chip_gen: v7x
topology: tpu7x:2x2x1
jax: 0.10.0
libtpu: 0.0.40
codegen_flags: <defaults>
</compile_context>

<pallas_src>
import jax
import jax.numpy as jnp
from jax.experimental import pallas as pl
from jax.experimental.pallas import tpu as pltpu


def _round_up(v, m):
    return (v + m - 1) // m * m


def _vmem_budget():
    """Return (working-set budget, vmem_limit_bytes) for the current chip."""
    cap = 64 << 20
    try:
        cap = int(pltpu.get_tpu_info().vmem_capacity_bytes)
    except Exception:
        pass  # conservative default works everywhere
    if cap <= (64 << 20):          # v7x-class: 64 MiB per TensorCore
        return 28 << 20, 40 << 20
    return 80 << 20, 100 << 20     # v5e / v6e: 128 MiB


def _select_tile_m(B, K, tn, xb, ob, budget, const_bytes):
    """Largest M tile whose double-buffered footprint fits `budget`."""
    sub = {4: 8, 2: 16, 1: 32}.get(xb, 8)     # sublane multiple per dtype
    per_row = 2 * (K * xb + tn * ob)          # double-buffered x row + out row
    tm = sub
    for cand in (2048, 1024, 512, 256, 128, 64, 32, 16, 8):
        if cand < sub:
            continue
        if const_bytes + cand * per_row <= budget:
            tm = cand
            break
    # Megacore: keep >= 2 M blocks when the batch allows it (v7x has 2 TCs).
    if B >= 2 * sub:
        tm = min(tm, _round_up((B + 1) // 2, sub))
    # Never exceed the batch: a full-dim M block is always layout-legal.
    if tm >= B:
        tm = B
    return tm


def _gen_tanh_kernel(x_ref, w_ref, b_ref, o_ref):
    # x_ref: (tm, K)  w_ref: (K, tn)  b_ref: (1, tn)  o_ref: (tm, tn)
    y = jnp.dot(x_ref[...], w_ref[...], preferred_element_type=jnp.float32)
    y = y + b_ref[...].astype(jnp.float32)
    o_ref[...] = jnp.tanh(y).astype(o_ref.dtype)


def generation_model_tanh(x, w_t, b, *, compute_dtype=None):
    """tanh(x @ w_t + b).

    x:   [B, input_size]
    w_t: [input_size, x_dim]   (pre-transposed nn.Linear weight)
    b:   [x_dim]
    compute_dtype: optional operand dtype for the MXU (e.g. jnp.bfloat16);
                   accumulation is always f32, output keeps x.dtype.
    """
    B, K = x.shape
    K2, N = w_t.shape
    assert K == K2 and b.shape == (N,)

    out_dtype = x.dtype
    if compute_dtype is not None:
        x = x.astype(compute_dtype)
        w_t = w_t.astype(compute_dtype)

    xb = jnp.dtype(x.dtype).itemsize
    wb = jnp.dtype(w_t.dtype).itemsize
    bb = jnp.dtype(b.dtype).itemsize
    ob = jnp.dtype(out_dtype).itemsize

    budget, vmem_limit = _vmem_budget()
    b2d = b.reshape(1, N)

    # Double-buffered cost of keeping the full weight + bias in VMEM.
    weight_bytes = 2 * K * N * wb + 2 * N * bb
    resident = weight_bytes <= budget // 2

    if resident:
        # Fast path: weight/bias resident (constant index_map -> fetched once),
        # grid over M only, full-dim N block (no padding, no slice copy).
        tile_m = _select_tile_m(B, K, N, xb, ob, budget, weight_bytes)
        grid = (pl.cdiv(B, tile_m),)
        in_specs = [
            pl.BlockSpec((tile_m, K), lambda i: (i, 0)),   # streamed activations
            pl.BlockSpec((K, N), lambda i: (0, 0)),        # resident weight
            pl.BlockSpec((1, N), lambda i: (0, 0)),        # resident bias
        ]
        out_specs = pl.BlockSpec((tile_m, N), lambda i: (i, 0))
        dims = ("parallel",)
    else:
        # Large-weight path: stream lane-dense (K, tn) weight tiles with N
        # innermost; the x tile's block index is constant across j, so it is
        # fetched once per M block.
        # TODO(synk): extremely large input_size (one (8,K) x tile plus one
        # (K,128) weight tile exceeding VMEM) would need a K-tiled accumulator
        # path; not needed for this generation head.
        tn = 256 if N >= 256 else 128
        const_bytes = 2 * K * tn * wb + 2 * tn * bb
        tile_m = _select_tile_m(B, K, tn, xb, ob, budget, const_bytes)
        grid = (pl.cdiv(B, tile_m), pl.cdiv(N, tn))
        in_specs = [
            pl.BlockSpec((tile_m, K), lambda i, j: (i, 0)),
            pl.BlockSpec((K, tn), lambda i, j: (0, j)),
            pl.BlockSpec((1, tn), lambda i, j: (0, j)),
        ]
        out_specs = pl.BlockSpec((tile_m, tn), lambda i, j: (i, j))
        dims = ("parallel", "parallel")

    cost = pl.CostEstimate(
        flops=2 * B * K * N,
        transcendentals=B * N,
        bytes_accessed=B * K * xb + K * N * wb + N * bb + B * N * ob,
    )

    out = pl.pallas_call(
        _gen_tanh_kernel,
        out_shape=jax.ShapeDtypeStruct((B, N), out_dtype),
        grid_spec=pltpu.PrefetchScalarGridSpec(
            num_scalar_prefetch=0,
            grid=grid,
            in_specs=in_specs,
            out_specs=out_specs,
        ),
        compiler_params=pltpu.CompilerParams(
            dimension_semantics=dims,
            vmem_limit_bytes=vmem_limit,
        ),
        cost_estimate=cost,
    )(x, w_t, b2d)

    return out


def init_params(key, input_size, x_dim, dtype=jnp.float32):
    """Deterministic init matching nn.Linear's default (uniform +-1/sqrt(fan_in))."""
    kw, kb = jax.random.split(key)
    bound = 1.0 / (input_size ** 0.5)
    # PyTorch stores weight as (x_dim, input_size); we keep the transposed
    # [input_size, x_dim] layout so the kernel computes x @ W directly.
    w_t = jax.random.uniform(kw, (input_size, x_dim), dtype, -bound, bound)
    b = jax.random.uniform(kb, (x_dim,), dtype, -bound, bound)
    return w_t, b


def reference(x, w_t, b):
    return jnp.tanh(x @ w_t + b[None, :])


if __name__ == "__main__":
    key = jax.random.PRNGKey(0)
    k_x, k_p, k_x2, k_p2 = jax.random.split(key, 4)

    # Shapes implied by the module: a small generation head.
    batch, input_size, x_dim = 8, 32, 16
    x = jax.random.normal(k_x, (batch, input_size), dtype=jnp.float32)
    w_t, b = init_params(k_p, input_size, x_dim)
    ref = reference(x, w_t, b)

    # f32 path (exact vs reference).
    out = jax.block_until_ready(generation_model_tanh(x, w_t, b))
    assert out.shape == (batch, x_dim)
    assert jnp.allclose(out, ref, atol=1e-5, rtol=1e-5), "f32 mismatch vs reference"

    # Ragged multi-M-block case (exercises megacore split + ragged last block).
    B2, K2, N2 = 40, 64, 48
    x2 = jax.random.normal(k_x2, (B2, K2), dtype=jnp.float32)
    w2, b2 = init_params(k_p2, K2, N2)
    ref2 = reference(x2, w2, b2)
    out2 = jax.block_until_ready(generation_model_tanh(x2, w2, b2))
    assert out2.shape == (B2, N2)
    assert jnp.allclose(out2, ref2, atol=1e-5, rtol=1e-5), "ragged-M mismatch"

    # bf16-operand path (MXU-friendly on v6e/v7x; f32 accumulation, f32 out).
    out_bf16 = jax.block_until_ready(
        generation_model_tanh(x, w_t, b, compute_dtype=jnp.bfloat16)
    )
    assert jnp.allclose(out_bf16, ref, atol=2e-2, rtol=2e-2), "bf16 mismatch"

    print("KERNEL_OK")
</pallas_src>

<mosaic_0001>
module attributes {stable_mosaic.version = 11 : i64} {
  func.func @_gen_tanh_kernel(%arg0: i32, %arg1: memref<8x32xf32, #tpu.memory_space<vmem>>, %arg2: memref<32x16xf32, #tpu.memory_space<vmem>>, %arg3: memref<1x16xf32, #tpu.memory_space<vmem>>, %arg4: memref<8x16xf32, #tpu.memory_space<vmem>>) attributes {dimension_semantics = [#tpu.dimension_semantics<parallel>], iteration_bounds = array<i64: 1>, scalar_prefetch = 0 : i64, scratch_operands = 0 : i64, tpu.core_type = #tpu.core_type<tc>, window_params = [{transform_indices = @transform_0, window_bounds = array<i64: 8, 32>}, {pipeline_mode = #tpu.pipeline_mode<synchronous>, transform_indices = @transform_1, window_bounds = array<i64: 32, 16>}, {pipeline_mode = #tpu.pipeline_mode<synchronous>, transform_indices = @transform_2, window_bounds = array<i64: 1, 16>}, {transform_indices = @transform_3, window_bounds = array<i64: 8, 16>}]} {
    %c0 = arith.constant 0 : index
    %c0_0 = arith.constant 0 : index
    %0 = vector.load %arg1[%c0, %c0_0] : memref<8x32xf32, #tpu.memory_space<vmem>>, vector<8x32xf32>
    %c0_1 = arith.constant 0 : index
    %c0_2 = arith.constant 0 : index
    %1 = vector.load %arg2[%c0_1, %c0_2] : memref<32x16xf32, #tpu.memory_space<vmem>>, vector<32x16xf32>
    %cst = arith.constant dense<0.000000e+00> : vector<8x16xf32>
    %2 = tpu.matmul %0, %1, %cst {dimension_numbers = #tpu.dot_dimension_numbers<[1], [0], [0], [1], [0, 0, 1, 1], [], []>} : vector<8x32xf32>, vector<32x16xf32>, vector<8x16xf32> -> vector<8x16xf32>
    %c0_3 = arith.constant 0 : index
    %c0_4 = arith.constant 0 : index
    %3 = vector.load %arg3[%c0_3, %c0_4] : memref<1x16xf32, #tpu.memory_space<vmem>>, vector<1x16xf32>
    %4 = vector.broadcast %3 : vector<1x16xf32> to vector<8x16xf32>
    %5 = arith.addf %2, %4 : vector<8x16xf32>
    %6 = math.tanh %5 : vector<8x16xf32>
    %c0_5 = arith.constant 0 : index
    %c0_6 = arith.constant 0 : index
    %7 = vector.load %arg4[%c0_5, %c0_6] : memref<8x16xf32, #tpu.memory_space<vmem>>, vector<8x16xf32>
    tpu.vector_store %arg4[%c0_5, %c0_6], %6 {strides = array<i32>} : memref<8x16xf32, #tpu.memory_space<vmem>>, vector<8x16xf32>,
    return
  }
  func.func @transform_0(%arg0: i32) -> (i32, i32) {
    %c0_i32 = arith.constant 0 : i32
    %c0_i32_0 = arith.constant 0 : i32
    return %arg0, %c0_i32 : i32, i32
  }
  func.func @transform_1(%arg0: i32) -> (i32, i32) {
    %c0_i32 = arith.constant 0 : i32
    %c0_i32_0 = arith.constant 0 : i32
    %c0_i32_1 = arith.constant 0 : i32
    return %c0_i32, %c0_i32_0 : i32, i32
  }
  func.func @transform_2(%arg0: i32) -> (i32, i32) {
    %c0_i32 = arith.constant 0 : i32
    %c0_i32_0 = arith.constant 0 : i32
    %c0_i32_1 = arith.constant 0 : i32
    return %c0_i32, %c0_i32_0 : i32, i32
  }
  func.func @transform_3(%arg0: i32) -> (i32, i32) {
    %c0_i32 = arith.constant 0 : i32
    %c0_i32_0 = arith.constant 0 : i32
    return %arg0, %c0_i32 : i32, i32
  }
}

</mosaic_0001>

<bundles_post_ra>
// kernel: tpu_custom_call.1
= control target key start
LH: loop header
LB: loop body
LE: loop exit
PB: predicated region body
PF: predicated region fallthrough
CT: control target
= control target key end

     0   :  { %v172_v3 = vmov 0.0|0.0   ;;  %vm173_vm0 = vmmov 0   ;;  %v174_v6 = vmov 0.0   ;;  %s226_s0 = inlined_call_operand.vmem [shape: f32[8,32], index: 0, kind: input, shape index: {}]   ;;  %s227_s1 = inlined_call_operand.vmem [shape: f32[32,16], index: 1, kind: input, shape index: {}]   ;;  %s228_s2 = inlined_call_operand.vmem [shape: f32[1,16], index: 2, kind: input, shape index: {}]   ;;  %s229_s3 = inlined_call_operand.hbm [shape: f32[8,16], index: 3, kind: output, shape index: {}]  }
   0x1   :  { %v16_v0 = vld [vmem:[%s227_s1] sm:$0xff]  ;;  %v17_v1 = vld [vmem:[%s227_s1 + $0x8] sm:$0xff]  ;;  %v18_v2 = vld [vmem:[%s227_s1 + $0x10] sm:$0xff]  ;;  %136 = vmatprep.subr.bf16.mxu0 %v172_v3  ;;  %133 = vmatprep.mubr.msk.f32.mxu0 %vm173_vm0, %v174_v6 }
   0x2   :  { %v137_v4 = vpack.c.bf16 %v17_v1, %v16_v0  ;;  %v19_v5 = vld [vmem:[%s227_s1 + $0x18] sm:$0xff] }
   0x3   :  { %8 = vsyncpa [#allocation3], 0  ;;  %v140_v7 = vpack.c.bf16 %v19_v5, %v18_v2  ;;  %v15_v8 = vld [vmem:[%s226_s0] sm:$0xff]  ;;  %vm27_vm1 = vcmask 261120   ;;  %s175_s1 = smov [#allocation2]   ;;  %vm102_vm2 = vcmask 130048  }
   0x4   :  { %138 = vmatpush3.bf16.msra.mxu0 %v137_v4  ;;  %v118_v9 = vld [vmem:[%s228_s2] ss:$0 sm:$0xff]  ;;  %s110_s24 = sshll.u32 %s175_s1, 4  ;;  %s111_s24 = int_to_ptr.vmem [resolvable:$true] %s110_s24 }
   0x5   :  { %139 = vmatprep.subr.bf16.mxu0 %v172_v3  ;;  %s148_s25 = scalar_lea.vmem %s111_s24, 128  ;;  %p153_p1 = scmp.lt.s32.totalorder %s111_s24, %s111_s24 }
   0x6   :  { %p149_p0 = scmp.ne.s32.totalorder %s111_s24, %s148_s25  ;;  %p154_p2 = scmp.lt.s32.totalorder %s148_s25, %s148_s25 }
   0x8   :  { %141 = vmatpush3.bf16.msra.mxu0 %v140_v7  ;;  %p155_p3 = por %p154_p2, %p153_p1 }
   0xa   :  { %p156_p4 = pnand %p155_p3, %p149_p0 }
   0xb   :  { %134 = vmatmul.mubr.msk.f32.vlgmr.msra.gmra.mrb[0].mxu0 %vm27_vm1, %v15_v8 }
  0xde   :  { %v97_v10 = vpop.f32.mrb[0].mxu0 }
  0xdf   :  { %v98_v11 = vadd.f32 %v118_v9, %v97_v10  ;;  %v135_v12 = vpop.f32.mrb[1].mxu0 }
  0xe1   :  { %146 = vtanh.f32 %v98_v11 }
  0xeb   :  { %v147_v13 = vpop.eup %146 }
  0xec   :  { %103 = vst.msk [vmem:[#allocation2] sm:$0xff] %vm102_vm2, %v147_v13 }
  0xed   :  { %159 = shalt.err (!%p156_p4)
}
  0xee   :  { %s160_s2 = scalar_lea.hbm %s229_s3, 128 }
  0xef   :  { %p161_p5 = scmp.ne.s32.totalorder %s229_s3, %s160_s2  ;;  %p164_p6 = scmp.lt.u32.totalorder %s160_s2, %s229_s3 }
  0xf1   :  { %p166_p7 = pnand %p164_p6, %p161_p5 }
  0xf3   :  { %169 = shalt.err (!%p166_p7)
}
  0xf4   :  { %113 = dma.vmem_to_hbm [thread:$0]  %s111_s24, 128, %s229_s3, [#allocation3]  }
  0xf5   :  { %170 = dma.done.wait [#allocation3], 128  }
  0xf6   :  { %171 = vsyncadd [#allocation3], 4294967168 }
  0xf7   :  { %117 = vsyncpa [#allocation3], 1 }

</bundles_post_ra>
